<compile_context>
chip_gen: v6e
topology: v6e:2x2x1
jax: 0.10.0
libtpu: 0.0.40
codegen_flags: <defaults>
</compile_context>

<pallas_src>
import functools

import jax
import jax.numpy as jnp
from jax.experimental import pallas as pl
from jax.experimental.pallas import tpu as pltpu

NEURONS = 100        # hidden width from the PyTorch module
H_PAD = 128          # hidden padded to one full lane tile
ONE_COL = NEURONS    # reserved lane carrying a constant 1.0 (bias folding)
A_PAD = 128          # q-value lanes padded to a full tile


def _round_up(x, m):
    return -(-x // m) * m


def _mlp_kernel(x_ref, w1_ref, w2_ref, w3_ref, out_ref):
    # Biases are folded into the augmented weight matrices via the constant-1
    # column, so the body is exactly three MXU matmuls and two ReLUs.
    h1 = jnp.maximum(
        jnp.dot(x_ref[...], w1_ref[...], preferred_element_type=jnp.float32), 0.0)
    h2 = jnp.maximum(
        jnp.dot(h1, w2_ref[...], preferred_element_type=jnp.float32), 0.0)
    q = jnp.dot(h2, w3_ref[...], preferred_element_type=jnp.float32)
    out_ref[...] = q.astype(out_ref.dtype)


@functools.partial(jax.jit, static_argnames=("nb_action",))
def network_forward(state, w1_aug, w2_aug, w3_aug, *, nb_action):
    """q_values = fc3(relu(fc2(relu(fc1(state))))) via a single fused Pallas kernel."""
    B, D_in = state.shape
    B_pad = _round_up(max(B, 8), 8)
    D_pad = w1_aug.shape[0]

    # Pad the batch to a sublane multiple and append the constant-1 column that
    # the augmented W1 uses to inject the fc1 bias.
    x_pad = jnp.zeros((B_pad, D_pad), jnp.float32)
    x_pad = x_pad.at[:B, :D_in].set(state.astype(jnp.float32))
    x_pad = x_pad.at[:, D_in].set(1.0)

    vmem = pl.BlockSpec(memory_space=pltpu.MemorySpace.VMEM)
    # NOTE: if batch ever grows to hundreds of rows, add a grid over B with the
    # weights given constant index_maps and that axis marked "parallel" (v7x has
    # two TensorCores). At B<=8 a single un-pipelined invocation is fastest.
    q_pad = pl.pallas_call(
        _mlp_kernel,
        out_shape=jax.ShapeDtypeStruct((B_pad, A_PAD), jnp.float32),
        in_specs=[vmem, vmem, vmem, vmem],
        out_specs=vmem,
    )(x_pad, w1_aug, w2_aug, w3_aug)

    return q_pad[:B, :nb_action]


def init_params(key, input_size, nb_action, neurons=NEURONS):
    """PyTorch nn.Linear-style init (U[-1/sqrt(fan_in), 1/sqrt(fan_in)]).

    Returns (packed, raw):
      packed: bias-folded, tile-padded weight matrices fed to the kernel.
      raw:    plain (W, b) pairs used by the pure-JAX reference.
    """
    assert neurons < H_PAD, "ONE_COL trick needs a spare lane in the 128-wide tile"
    ks = jax.random.split(key, 6)

    def linear(kw, kb, fan_in, fan_out):
        bound = 1.0 / jnp.sqrt(jnp.float32(fan_in))
        w = jax.random.uniform(kw, (fan_in, fan_out), jnp.float32, -bound, bound)
        b = jax.random.uniform(kb, (fan_out,), jnp.float32, -bound, bound)
        return w, b

    w1, b1 = linear(ks[0], ks[1], input_size, neurons)
    w2, b2 = linear(ks[2], ks[3], neurons, neurons)
    w3, b3 = linear(ks[4], ks[5], neurons, nb_action)

    d_pad = _round_up(input_size + 1, 8)   # room for the constant-1 input column

    # Layer 1: rows 0..D_in-1 = W1, row D_in = b1, plus a 1.0 that creates the
    # constant-1 lane (index ONE_COL) in h1. Padded rows/cols stay zero.
    w1_aug = jnp.zeros((d_pad, H_PAD), jnp.float32)
    w1_aug = w1_aug.at[:input_size, :neurons].set(w1)
    w1_aug = w1_aug.at[input_size, :neurons].set(b1)
    w1_aug = w1_aug.at[input_size, ONE_COL].set(1.0)

    # Layer 2: row ONE_COL = b2 (consumed by h1's constant-1 lane); the 1.0 at
    # (ONE_COL, ONE_COL) propagates the constant-1 lane into h2.
    w2_aug = jnp.zeros((H_PAD, H_PAD), jnp.float32)
    w2_aug = w2_aug.at[:neurons, :neurons].set(w2)
    w2_aug = w2_aug.at[ONE_COL, :neurons].set(b2)
    w2_aug = w2_aug.at[ONE_COL, ONE_COL].set(1.0)

    # Layer 3: row ONE_COL = b3. Padded output lanes are exactly zero.
    w3_aug = jnp.zeros((H_PAD, A_PAD), jnp.float32)
    w3_aug = w3_aug.at[:neurons, :nb_action].set(w3)
    w3_aug = w3_aug.at[ONE_COL, :nb_action].set(b3)

    packed = {"w1_aug": w1_aug, "w2_aug": w2_aug, "w3_aug": w3_aug}
    raw = {"w1": w1, "b1": b1, "w2": w2, "b2": b2, "w3": w3, "b3": b3}
    return packed, raw


def reference_forward(state, p):
    h1 = jnp.maximum(state @ p["w1"] + p["b1"], 0.0)
    h2 = jnp.maximum(h1 @ p["w2"] + p["b2"], 0.0)
    return h2 @ p["w3"] + p["b3"]


if __name__ == "__main__":
    key = jax.random.PRNGKey(0)
    k_state, k_params = jax.random.split(key)

    batch = 2
    input_size = 5     # typical sensor-state size for this game AI
    nb_action = 3

    state = jax.random.normal(k_state, (batch, input_size), jnp.float32)
    packed, raw = init_params(k_params, input_size, nb_action)

    q_values = network_forward(
        state,
        packed["w1_aug"], packed["w2_aug"], packed["w3_aug"],
        nb_action=nb_action,
    )
    q_values = jax.block_until_ready(q_values)

    ref = reference_forward(state, raw)
    assert q_values.shape == (batch, nb_action)
    assert jnp.allclose(q_values, ref, atol=1e-4, rtol=1e-4)

    print("KERNEL_OK")
</pallas_src>

<mosaic_0001>
module attributes {stable_mosaic.version = 11 : i64} {
  func.func @_mlp_kernel(%arg0: memref<8x8xf32, #tpu.memory_space<vmem>>, %arg1: memref<8x128xf32, #tpu.memory_space<vmem>>, %arg2: memref<128x128xf32, #tpu.memory_space<vmem>>, %arg3: memref<128x128xf32, #tpu.memory_space<vmem>>, %arg4: memref<8x128xf32, #tpu.memory_space<vmem>>) attributes {dimension_semantics = [], scalar_prefetch = 0 : i64, scratch_operands = 0 : i64, tpu.core_type = #tpu.core_type<tc>} {
    %c0 = arith.constant 0 : index
    %c0_0 = arith.constant 0 : index
    %0 = vector.load %arg0[%c0, %c0_0] : memref<8x8xf32, #tpu.memory_space<vmem>>, vector<8x8xf32>
    %c0_1 = arith.constant 0 : index
    %c0_2 = arith.constant 0 : index
    %1 = vector.load %arg1[%c0_1, %c0_2] : memref<8x128xf32, #tpu.memory_space<vmem>>, vector<8x128xf32>
    %cst = arith.constant dense<0.000000e+00> : vector<8x128xf32>
    %2 = tpu.matmul %0, %1, %cst {dimension_numbers = #tpu.dot_dimension_numbers<[1], [0], [0], [1], [0, 0, 1, 1], [], []>} : vector<8x8xf32>, vector<8x128xf32>, vector<8x128xf32> -> vector<8x128xf32>
    %cst_3 = arith.constant 0.000000e+00 : f32
    %3 = vector.broadcast %cst_3 : f32 to vector<8x128xf32>
    %4 = arith.maximumf %2, %3 : vector<8x128xf32>
    %c0_4 = arith.constant 0 : index
    %c0_5 = arith.constant 0 : index
    %5 = vector.load %arg2[%c0_4, %c0_5] : memref<128x128xf32, #tpu.memory_space<vmem>>, vector<128x128xf32>
    %cst_6 = arith.constant dense<0.000000e+00> : vector<8x128xf32>
    %6 = tpu.matmul %4, %5, %cst_6 {dimension_numbers = #tpu.dot_dimension_numbers<[1], [0], [0], [1], [0, 0, 1, 1], [], []>} : vector<8x128xf32>, vector<128x128xf32>, vector<8x128xf32> -> vector<8x128xf32>
    %cst_7 = arith.constant 0.000000e+00 : f32
    %7 = vector.broadcast %cst_7 : f32 to vector<8x128xf32>
    %8 = arith.maximumf %6, %7 : vector<8x128xf32>
    %c0_8 = arith.constant 0 : index
    %c0_9 = arith.constant 0 : index
    %9 = vector.load %arg3[%c0_8, %c0_9] : memref<128x128xf32, #tpu.memory_space<vmem>>, vector<128x128xf32>
    %cst_10 = arith.constant dense<0.000000e+00> : vector<8x128xf32>
    %10 = tpu.matmul %8, %9, %cst_10 {dimension_numbers = #tpu.dot_dimension_numbers<[1], [0], [0], [1], [0, 0, 1, 1], [], []>} : vector<8x128xf32>, vector<128x128xf32>, vector<8x128xf32> -> vector<8x128xf32>
    %c0_11 = arith.constant 0 : index
    %c0_12 = arith.constant 0 : index
    %11 = vector.load %arg4[%c0_11, %c0_12] : memref<8x128xf32, #tpu.memory_space<vmem>>, vector<8x128xf32>
    tpu.vector_store %arg4[%c0_11, %c0_12], %10 {strides = array<i32>} : memref<8x128xf32, #tpu.memory_space<vmem>>, vector<8x128xf32>,
    return
  }
}

</mosaic_0001>

<bundles_post_ra>
// kernel: network_forward.1
= control target key start
LH: loop header
LB: loop body
LE: loop exit
PB: predicated region body
PF: predicated region fallthrough
CT: control target
= control target key end

     0   :  { %9 = vsyncpa [#allocation3], 0  ;;  %s549_s0 = inlined_call_operand.vmem [shape: f32[8,8], index: 0, kind: input, shape index: {}]   ;;  %s550_s1 = inlined_call_operand.vmem [shape: f32[8,128], index: 1, kind: input, shape index: {}]   ;;  %s551_s2 = inlined_call_operand.hbm [shape: f32[128,128], index: 2, kind: input, shape index: {}]   ;;  %s552_s3 = inlined_call_operand.hbm [shape: f32[128,128], index: 3, kind: input, shape index: {}]   ;;  %s553_s4 = inlined_call_operand.vmem [shape: f32[8,128], index: 4, kind: output, shape index: {}]  }
   0x1   :  { %10 = vsyncpa [#allocation5], 0  ;;  %s464_s15 = smov [#allocation2]  }
   0x2   :  { %s20_s16 = sshll.u32 %s464_s15, 4  ;;  %s21_s16 = int_to_ptr.vmem [resolvable:$true] %s20_s16 }
   0x3   :  { %s428_s17 = scalar_lea.vmem %s21_s16, 2048  ;;  %p433_p1 = scmp.lt.s32.totalorder %s21_s16, %s21_s16 }
   0x4   :  { %p429_p0 = scmp.ne.s32.totalorder %s21_s16, %s428_s17  ;;  %p434_p2 = scmp.lt.s32.totalorder %s428_s17, %s428_s17 }
   0x6   :  { %p435_p3 = por %p434_p2, %p433_p1 }
   0x8   :  { %p436_p4 = pnand %p435_p3, %p429_p0 }
   0xa   :  { %439 = shalt.err (!%p436_p4)
}
   0xb   :  { %s465_s18 = smov 128   ;;  %s466_s19 = smov 8  }
   0xc   :  { %26 = dma.hbm_to_vmem [thread:$0]  %s551_s2, 2048, %s21_s16, [#allocation3], %s465_s18, %s465_s18, %s466_s19  }
   0xd   :  { %s467_s22 = smov [#allocation4]  }
   0xe   :  { %s32_s23 = sshll.u32 %s467_s22, 4  ;;  %s33_s23 = int_to_ptr.vmem [resolvable:$true] %s32_s23 }
   0xf   :  { %s448_s24 = scalar_lea.vmem %s33_s23, 2048  ;;  %p453_p6 = scmp.lt.s32.totalorder %s33_s23, %s33_s23 }
  0x10   :  { %p449_p5 = scmp.ne.s32.totalorder %s33_s23, %s448_s24  ;;  %p454_p7 = scmp.lt.s32.totalorder %s448_s24, %s448_s24 }
  0x12   :  { %p455_p8 = por %p454_p7, %p453_p6 }
  0x14   :  { %p456_p9 = pnand %p455_p8, %p449_p5 }
  0x16   :  { %459 = shalt.err (!%p456_p9)
}
  0x17   :  { %38 = dma.hbm_to_vmem [thread:$0]  %s552_s3, 2048, %s33_s23, [#allocation5], %s465_s18, %s465_s18, %s466_s19  }
  0x18   :  { %460 = dma.done.wait [#allocation3], 2048  }
  0x19   :  { %461 = vsyncadd [#allocation3], 4294965248 }
  0x1a   :  { %462 = dma.done.wait [#allocation5], 2048  }
  0x1b   :  { %463 = vsyncadd [#allocation5], 4294965248  ;;  %v468_v0 = vmov 0.0   ;;  %vm469_vm0 = vmmov 0   ;;  %vm47_vm1 = vcmask 64512   ;;  %v46_v1 = vld [vmem:[%s550_s1] sm:$0xff] }
  0x1c   :  { %339 = vmatprep.subr.mxu0 %v468_v0  ;;  %341 = vmatprep.mubr.msk.f32.mxu0 %vm469_vm0, %v468_v0  ;;  %v45_v2 = vld [vmem:[%s549_s0] sm:$0xff]  ;;  %v137_v3 = vld [vmem:[#allocation2 + $0x78] sm:$0xff]  ;;  %v136_v4 = vld [vmem:[#allocation2 + $0x70] sm:$0xff] }
  0x1d   :  { %344 = vmatprep.subr.mxu1 %v468_v0  ;;  %376 = vmatprep.mubr.msk.f32.mxu1 %vm469_vm0, %v468_v0  ;;  %v135_v5 = vld [vmem:[#allocation2 + $0x68] sm:$0xff]  ;;  %v134_v6 = vld [vmem:[#allocation2 + $0x60] sm:$0xff]  ;;  %v133_v7 = vld [vmem:[#allocation2 + $0x58] sm:$0xff] }
  0x1e   :  { %340 = vmatpush3.msra.mxu0 %v46_v1  ;;  %345 = vmatpush3.msra.mxu1 %v137_v3  ;;  %v132_v8 = vld [vmem:[#allocation2 + $0x50] sm:$0xff]  ;;  %v131_v9 = vld [vmem:[#allocation2 + $0x48] sm:$0xff]  ;;  %v130_v10 = vld [vmem:[#allocation2 + $0x40] sm:$0xff] }
  0x1f   :  { %342 = vmatmul.mubr.msk.f32.vlgmr.msra.gmra.mxu0 %vm47_vm1, %v45_v2  ;;  %346 = vmatprep.subr.mxu1 %v468_v0  ;;  %v129_v11 = vld [vmem:[#allocation2 + $0x38] sm:$0xff]  ;;  %v128_v12 = vld [vmem:[#allocation2 + $0x30] sm:$0xff]  ;;  %v127_v13 = vld [vmem:[#allocation2 + $0x28] sm:$0xff] }
  0x20   :  { %347 = vmatpush3.msra.mxu1 %v136_v4  ;;  %379 = vmatprep.subr.mxu0 %v468_v0  ;;  %v126_v14 = vld [vmem:[#allocation2 + $0x20] sm:$0xff]  ;;  %v125_v15 = vld [vmem:[#allocation2 + $0x18] sm:$0xff]  ;;  %v124_v16 = vld [vmem:[#allocation2 + $0x10] sm:$0xff] }
  0x21   :  { %348 = vmatprep.subr.mxu1 %v468_v0  ;;  %411 = vmatprep.mubr.msk.f32.mxu0 %vm469_vm0, %v468_v0  ;;  %v123_v17 = vld [vmem:[#allocation2 + $0x8] sm:$0xff]  ;;  %v122_v18 = vld [vmem:[#allocation2] sm:$0xff]  ;;  %v224_v19 = vld [vmem:[#allocation4 + $0x78] sm:$0xff] }
  0x22   :  { %349 = vmatpush3.msra.mxu1 %v135_v5  ;;  %v223_v20 = vld [vmem:[#allocation4 + $0x70] sm:$0xff]  ;;  %380 = vmatpush3.msra.mxu0 %v224_v19  ;;  %v222_v21 = vld [vmem:[#allocation4 + $0x68] sm:$0xff]  ;;  %v221_v22 = vld [vmem:[#allocation4 + $0x60] sm:$0xff] }
  0x23   :  { %350 = vmatprep.subr.mxu1 %v468_v0  ;;  %381 = vmatprep.subr.mxu0 %v468_v0  ;;  %v220_v23 = vld [vmem:[#allocation4 + $0x58] sm:$0xff]  ;;  %v219_v24 = vld [vmem:[#allocation4 + $0x50] sm:$0xff]  ;;  %v218_v25 = vld [vmem:[#allocation4 + $0x48] sm:$0xff] }
  0x24   :  { %351 = vmatpush3.msra.mxu1 %v134_v6  ;;  %382 = vmatpush3.msra.mxu0 %v223_v20  ;;  %v217_v26 = vld [vmem:[#allocation4 + $0x40] sm:$0xff]  ;;  %v216_v27 = vld [vmem:[#allocation4 + $0x38] sm:$0xff]  ;;  %v215_v28 = vld [vmem:[#allocation4 + $0x30] sm:$0xff] }
  0x25   :  { %352 = vmatprep.subr.mxu1 %v468_v0  ;;  %383 = vmatprep.subr.mxu0 %v468_v0  ;;  %v214_v29 = vld [vmem:[#allocation4 + $0x28] sm:$0xff]  ;;  %v213_v30 = vld [vmem:[#allocation4 + $0x20] sm:$0xff]  ;;  %v212_v31 = vld [vmem:[#allocation4 + $0x18] sm:$0xff] }
  0x26   :  { %353 = vmatpush3.msra.mxu1 %v133_v7  ;;  %384 = vmatpush3.msra.mxu0 %v222_v21  ;;  %v211_v32 = vld [vmem:[#allocation4 + $0x10] sm:$0xff]  ;;  %v210_v36 = vld [vmem:[#allocation4 + $0x8] sm:$0xff]  ;;  %v209_v37 = vld [vmem:[#allocation4] sm:$0xff] }
  0x27   :  { %354 = vmatprep.subr.mxu1 %v468_v0  ;;  %385 = vmatprep.subr.mxu0 %v468_v0 }
  0x28   :  { %355 = vmatpush3.msra.mxu1 %v132_v8  ;;  %386 = vmatpush3.msra.mxu0 %v221_v22 }
  0x29   :  { %356 = vmatprep.subr.mxu1 %v468_v0  ;;  %387 = vmatprep.subr.mxu0 %v468_v0 }
  0x2a   :  { %357 = vmatpush3.msra.mxu1 %v131_v9  ;;  %388 = vmatpush3.msra.mxu0 %v220_v23 }
  0x2b   :  { %358 = vmatprep.subr.mxu1 %v468_v0  ;;  %389 = vmatprep.subr.mxu0 %v468_v0 }
  0x2c   :  { %359 = vmatpush3.msra.mxu1 %v130_v10  ;;  %390 = vmatpush3.msra.mxu0 %v219_v24 }
  0x2d   :  { %360 = vmatprep.subr.mxu1 %v468_v0  ;;  %391 = vmatprep.subr.mxu0 %v468_v0 }
  0x2e   :  { %361 = vmatpush3.msra.mxu1 %v129_v11  ;;  %392 = vmatpush3.msra.mxu0 %v218_v25 }
  0x2f   :  { %362 = vmatprep.subr.mxu1 %v468_v0  ;;  %393 = vmatprep.subr.mxu0 %v468_v0 }
  0x30   :  { %363 = vmatpush3.msra.mxu1 %v128_v12  ;;  %394 = vmatpush3.msra.mxu0 %v217_v26 }
  0x31   :  { %364 = vmatprep.subr.mxu1 %v468_v0  ;;  %395 = vmatprep.subr.mxu0 %v468_v0 }
  0x32   :  { %365 = vmatpush3.msra.mxu1 %v127_v13  ;;  %396 = vmatpush3.msra.mxu0 %v216_v27 }
  0x33   :  { %366 = vmatprep.subr.mxu1 %v468_v0  ;;  %397 = vmatprep.subr.mxu0 %v468_v0 }
  0x34   :  { %367 = vmatpush3.msra.mxu1 %v126_v14  ;;  %398 = vmatpush3.msra.mxu0 %v215_v28 }
  0x35   :  { %368 = vmatprep.subr.mxu1 %v468_v0  ;;  %399 = vmatprep.subr.mxu0 %v468_v0 }
  0x36   :  { %369 = vmatpush3.msra.mxu1 %v125_v15  ;;  %400 = vmatpush3.msra.mxu0 %v214_v29 }
  0x37   :  { %370 = vmatprep.subr.mxu1 %v468_v0  ;;  %401 = vmatprep.subr.mxu0 %v468_v0 }
  0x38   :  { %371 = vmatpush3.msra.mxu1 %v124_v16  ;;  %402 = vmatpush3.msra.mxu0 %v213_v30 }
  0x39   :  { %372 = vmatprep.subr.mxu1 %v468_v0  ;;  %403 = vmatprep.subr.mxu0 %v468_v0 }
  0x3a   :  { %373 = vmatpush3.msra.mxu1 %v123_v17  ;;  %404 = vmatpush3.msra.mxu0 %v212_v31 }
  0x3b   :  { %374 = vmatprep.subr.mxu1 %v468_v0  ;;  %405 = vmatprep.subr.mxu0 %v468_v0 }
  0x3c   :  { %375 = vmatpush3.msra.mxu1 %v122_v18  ;;  %406 = vmatpush3.msra.mxu0 %v211_v32 }
  0x3d   :  { %407 = vmatprep.subr.mxu0 %v468_v0 }
  0x3e   :  { %408 = vmatpush3.msra.mxu0 %v210_v36 }
  0x3f   :  { %409 = vmatprep.subr.mxu0 %v468_v0 }
  0x40   :  { %410 = vmatpush3.msra.mxu0 %v209_v37 }
  0xdf   :  { %v117_v33 = vpop.f32.mrf.mxu0 }
  0xe0   :  { %v121_v34 = vmax.f32 %v117_v33, 0.0 }
  0xe1   :  { %v343_v35 = vpop.f32.mrf.mxu0 }
  0xe2   :  { %377 = vmatmul.mubr.f32.vlgmr.msra.gmra.mxu1 %v121_v34 }
 0x1a2   :  { %v204_v38 = vpop.f32.mrf.mxu1 }
 0x1a3   :  { %v208_v39 = vmax.f32 %v204_v38, 0.0 }
 0x1a4   :  { %v378_v40 = vpop.f32.mrf.mxu1 }
 0x1a5   :  { %412 = vmatmul.mubr.f32.vlgmr.msra.gmra.mxu0 %v208_v39 }
 0x265   :  { %v291_v41 = vpop.f32.mrf.mxu0 }
 0x266   :  { %295 = vst [vmem:[%s553_s4] sm:$0xff] %v291_v41 }
 0x267   :  { %v413_v42 = vpop.f32.mrf.mxu0 }
 0x268   :  { %300 = vsyncpa [#allocation3], 1 }
 0x269   :  { %301 = vsyncpa [#allocation5], 1 }

</bundles_post_ra>
